<compile_context>
chip_gen: v5e
topology: v5e:2x2
jax: 0.10.0
libtpu: 0.0.40
codegen_flags: <defaults>
</compile_context>

<pallas_src>
import math

import jax
import jax.numpy as jnp
from jax.experimental import pallas as pl
from jax.experimental.pallas import tpu as pltpu

_INV_SQRT2 = 1.0 / math.sqrt(2.0)


def _mlp_kernel(x_ref, w1_ref, b1_ref, w2_ref, b2_ref, o_ref, acc_ref):
    # x_ref:  (tm, H)   token tile
    # w1_ref: (H, ti)   fc1 weight slab for intermediate tile k
    # b1_ref: (1, ti)   fc1 bias slab
    # w2_ref: (ti, H)   fc2 weight slab for intermediate tile k
    # b2_ref: (1, H)    fc2 bias
    # o_ref:  (tm, H)   output tile (written only on the last k step)
    # acc_ref:(tm, H)   f32 accumulator, resident across the k (reduction) axis
    k = pl.program_id(1)

    @pl.when(k == 0)
    def _():
        acc_ref[...] = jnp.zeros_like(acc_ref)

    x = x_ref[...]

    # fc1 slice (MXU, f32 accumulation) + bias
    h = jnp.dot(x, w1_ref[...], preferred_element_type=jnp.float32)
    h = h + b1_ref[...].astype(jnp.float32)

    # exact (erf) GELU in f32 -- matches transformers ACT2FN["gelu"]
    h = 0.5 * h * (1.0 + jax.lax.erf(h * _INV_SQRT2))

    # partial fc2: accumulate this intermediate slice's contribution
    acc_ref[...] += jnp.dot(h.astype(w2_ref.dtype), w2_ref[...],
                            preferred_element_type=jnp.float32)

    @pl.when(k == pl.num_programs(1) - 1)
    def _():
        o_ref[...] = (acc_ref[...] + b2_ref[...].astype(jnp.float32)
                      ).astype(o_ref.dtype)
        # TODO(synk): resid_dropout is inference-mode identity here; a
        # PRNG-based dropout path would be needed for training.


def _round_up(x, m):
    return (x + m - 1) // m * m


def fsgpt_mlp(hidden_states, w1, b1, w2, b2, *, tm=256, ti=512):
    """FSGPTMLP forward. hidden_states: [..., H]; w1: [H, I]; w2: [I, H]."""
    orig_shape = hidden_states.shape
    H = orig_shape[-1]
    I = w1.shape[1]
    dtype = hidden_states.dtype

    x = hidden_states.reshape(-1, H)
    M = x.shape[0]

    # Token tile: multiple of 8 sublanes, capped at tm.
    tm_eff = min(tm, _round_up(M, 8))
    M_pad = _round_up(M, tm_eff)

    # Intermediate tile: multiple of 128 lanes, capped at ti.
    ti_eff = min(ti, _round_up(I, 128))
    I_pad = _round_up(I, ti_eff)

    # Zero-pad ragged shapes: padded token rows are sliced off after the call;
    # padded intermediate columns (zero w1 cols + zero w2 rows) contribute 0.
    if M_pad != M:
        x = jnp.pad(x, ((0, M_pad - M), (0, 0)))
    if I_pad != I:
        w1 = jnp.pad(w1, ((0, 0), (0, I_pad - I)))
        b1 = jnp.pad(b1, ((0, I_pad - I),))
        w2 = jnp.pad(w2, ((0, I_pad - I), (0, 0)))

    b1_2d = b1.reshape(1, I_pad)
    b2_2d = b2.reshape(1, H)

    grid = (M_pad // tm_eff, I_pad // ti_eff)

    itemsize = jnp.dtype(dtype).itemsize
    # VMEM budget: double-buffered x/out tiles, double-buffered weight slabs
    # (they cycle over k), b2, the f32 accumulator, plus the (tm, ti) GELU
    # intermediate.
    vmem_bytes = (
        2 * tm_eff * H * itemsize                 # x tiles
        + 2 * tm_eff * H * itemsize               # out tiles
        + 2 * (H * ti_eff + ti_eff) * itemsize    # w1 + b1 slabs
        + 2 * ti_eff * H * itemsize               # w2 slabs
        + 2 * H * itemsize                        # b2
        + tm_eff * H * 4                          # f32 accumulator
        + tm_eff * ti_eff * 4                     # fc1/GELU intermediate
    )
    # TODO(synk): per-generation tile/limit selection (v7x only has 64 MiB VMEM).
    vmem_limit = min(max(int(vmem_bytes * 1.5) + (2 << 20), 32 << 20), 96 << 20)

    cost = pl.CostEstimate(
        flops=2 * 2 * M_pad * H * I_pad,                 # two matmuls
        transcendentals=M_pad * I_pad,                   # erf
        bytes_accessed=(x.size + w1.size + b1_2d.size + w2.size + b2_2d.size
                        + M_pad * H) * itemsize,
    )

    out = pl.pallas_call(
        _mlp_kernel,
        out_shape=jax.ShapeDtypeStruct((M_pad, H), dtype),
        grid_spec=pltpu.PrefetchScalarGridSpec(
            num_scalar_prefetch=0,
            grid=grid,
            in_specs=[
                pl.BlockSpec((tm_eff, H), lambda i, k: (i, 0)),   # x tile
                pl.BlockSpec((H, ti_eff), lambda i, k: (0, k)),   # w1 slab
                pl.BlockSpec((1, ti_eff), lambda i, k: (0, k)),   # b1 slab
                pl.BlockSpec((ti_eff, H), lambda i, k: (k, 0)),   # w2 slab
                pl.BlockSpec((1, H), lambda i, k: (0, 0)),        # b2
            ],
            out_specs=pl.BlockSpec((tm_eff, H), lambda i, k: (i, 0)),
            scratch_shapes=[pltpu.VMEM((tm_eff, H), jnp.float32)],
        ),
        compiler_params=pltpu.CompilerParams(
            dimension_semantics=("parallel", "arbitrary"),
            vmem_limit_bytes=vmem_limit,
        ),
        cost_estimate=cost,
    )(x, w1, b1_2d, w2, b2_2d)

    return out[:M].reshape(orig_shape)


def _reference(hidden_states, w1, b1, w2, b2):
    h = hidden_states @ w1 + b1
    h = jax.nn.gelu(h, approximate=False)
    return h @ w2 + b2


if __name__ == "__main__":
    # Small config consistent with FSGPTMLP: hidden=128, intermediate=512.
    batch, seq, hidden, intermediate = 2, 8, 128, 512

    key = jax.random.PRNGKey(0)
    k_x, k_w1, k_b1, k_w2, k_b2 = jax.random.split(key, 5)

    x = jax.random.normal(k_x, (batch, seq, hidden), dtype=jnp.float32)

    # nn.Linear-style uniform(-1/sqrt(fan_in), 1/sqrt(fan_in)) init.
    lim1 = 1.0 / math.sqrt(hidden)
    lim2 = 1.0 / math.sqrt(intermediate)
    w1 = jax.random.uniform(k_w1, (hidden, intermediate), jnp.float32, -lim1, lim1)
    b1 = jax.random.uniform(k_b1, (intermediate,), jnp.float32, -lim1, lim1)
    w2 = jax.random.uniform(k_w2, (intermediate, hidden), jnp.float32, -lim2, lim2)
    b2 = jax.random.uniform(k_b2, (hidden,), jnp.float32, -lim2, lim2)

    out = fsgpt_mlp(x, w1, b1, w2, b2)
    out = jax.block_until_ready(out)

    ref = _reference(x, w1, b1, w2, b2)
    assert out.shape == x.shape
    assert jnp.allclose(out, ref, atol=1e-4, rtol=1e-4), "mismatch vs reference"

    print("KERNEL_OK")
</pallas_src>

<mosaic_0001>
module attributes {stable_mosaic.version = 11 : i64} {
  func.func @_mlp_kernel(%arg0: i32, %arg1: i32, %arg2: memref<16x128xf32, #tpu.memory_space<vmem>>, %arg3: memref<128x512xf32, #tpu.memory_space<vmem>>, %arg4: memref<1x512xf32, #tpu.memory_space<vmem>>, %arg5: memref<512x128xf32, #tpu.memory_space<vmem>>, %arg6: memref<1x128xf32, #tpu.memory_space<vmem>>, %arg7: memref<16x128xf32, #tpu.memory_space<vmem>>, %arg8: memref<16x128xf32, #tpu.memory_space<vmem>>) attributes {dimension_semantics = [#tpu.dimension_semantics<parallel>, #tpu.dimension_semantics<arbitrary>], iteration_bounds = array<i64: 1, 1>, scalar_prefetch = 0 : i64, scratch_operands = 1 : i64, tpu.core_type = #tpu.core_type<tc>, window_params = [{transform_indices = @transform_0, window_bounds = array<i64: 16, 128>}, {transform_indices = @transform_1, window_bounds = array<i64: 128, 512>}, {transform_indices = @transform_2, window_bounds = array<i64: 1, 512>}, {transform_indices = @transform_3, window_bounds = array<i64: 512, 128>}, {pipeline_mode = #tpu.pipeline_mode<synchronous>, transform_indices = @transform_4, window_bounds = array<i64: 1, 128>}, {transform_indices = @transform_5, window_bounds = array<i64: 16, 128>}]} {
    %c0_i32 = arith.constant 0 : i32
    %0 = arith.cmpi eq, %arg1, %c0_i32 : i32
    %1 = arith.extui %0 : i1 to i32
    %c0_i32_0 = arith.constant 0 : i32
    %2 = arith.cmpi ne, %1, %c0_i32_0 : i32
    scf.if %2 {
      %cst_18 = arith.constant 0.000000e+00 : f32
      %25 = vector.broadcast %cst_18 : f32 to vector<16x128xf32>
      %c0_19 = arith.constant 0 : index
      %c0_20 = arith.constant 0 : index
      %26 = vector.load %arg8[%c0_19, %c0_20] : memref<16x128xf32, #tpu.memory_space<vmem>>, vector<16x128xf32>
      tpu.vector_store %arg8[%c0_19, %c0_20], %25 {strides = array<i32>} : memref<16x128xf32, #tpu.memory_space<vmem>>, vector<16x128xf32>,
    } else {
    }
    %c0 = arith.constant 0 : index
    %c0_1 = arith.constant 0 : index
    %3 = vector.load %arg2[%c0, %c0_1] : memref<16x128xf32, #tpu.memory_space<vmem>>, vector<16x128xf32>
    %c0_2 = arith.constant 0 : index
    %c0_3 = arith.constant 0 : index
    %4 = vector.load %arg3[%c0_2, %c0_3] : memref<128x512xf32, #tpu.memory_space<vmem>>, vector<128x512xf32>
    %cst = arith.constant dense<0.000000e+00> : vector<16x512xf32>
    %5 = tpu.matmul %3, %4, %cst {dimension_numbers = #tpu.dot_dimension_numbers<[1], [0], [0], [1], [0, 0, 1, 1], [], []>} : vector<16x128xf32>, vector<128x512xf32>, vector<16x512xf32> -> vector<16x512xf32>
    %c0_4 = arith.constant 0 : index
    %c0_5 = arith.constant 0 : index
    %6 = vector.load %arg4[%c0_4, %c0_5] : memref<1x512xf32, #tpu.memory_space<vmem>>, vector<1x512xf32>
    %7 = vector.broadcast %6 : vector<1x512xf32> to vector<16x512xf32>
    %8 = arith.addf %5, %7 : vector<16x512xf32>
    %cst_6 = arith.constant 5.000000e-01 : f32
    %9 = vector.broadcast %cst_6 : f32 to vector<16x512xf32>
    %10 = arith.mulf %9, %8 : vector<16x512xf32>
    %cst_7 = arith.constant 0.707106769 : f32
    %11 = vector.broadcast %cst_7 : f32 to vector<16x512xf32>
    %12 = arith.mulf %8, %11 : vector<16x512xf32>
    %13 = math.erf %12 : vector<16x512xf32>
    %cst_8 = arith.constant 1.000000e+00 : f32
    %14 = vector.broadcast %cst_8 : f32 to vector<16x512xf32>
    %15 = arith.addf %14, %13 : vector<16x512xf32>
    %16 = arith.mulf %10, %15 : vector<16x512xf32>
    %c0_9 = arith.constant 0 : index
    %c0_10 = arith.constant 0 : index
    %17 = vector.load %arg8[%c0_9, %c0_10] : memref<16x128xf32, #tpu.memory_space<vmem>>, vector<16x128xf32>
    %c0_11 = arith.constant 0 : index
    %c0_12 = arith.constant 0 : index
    %18 = vector.load %arg5[%c0_11, %c0_12] : memref<512x128xf32, #tpu.memory_space<vmem>>, vector<512x128xf32>
    %cst_13 = arith.constant dense<0.000000e+00> : vector<16x128xf32>
    %19 = tpu.matmul %16, %18, %cst_13 {dimension_numbers = #tpu.dot_dimension_numbers<[1], [0], [0], [1], [0, 0, 1, 1], [], []>} : vector<16x512xf32>, vector<512x128xf32>, vector<16x128xf32> -> vector<16x128xf32>
    %20 = arith.addf %17, %19 : vector<16x128xf32>
    %c0_14 = arith.constant 0 : index
    %c0_15 = arith.constant 0 : index
    %21 = vector.load %arg8[%c0_14, %c0_15] : memref<16x128xf32, #tpu.memory_space<vmem>>, vector<16x128xf32>
    tpu.vector_store %arg8[%c0_14, %c0_15], %20 {strides = array<i32>} : memref<16x128xf32, #tpu.memory_space<vmem>>, vector<16x128xf32>,
    %c0_i32_16 = arith.constant 0 : i32
    %22 = arith.cmpi eq, %arg1, %c0_i32_16 : i32
    %23 = arith.extui %22 : i1 to i32
    %c0_i32_17 = arith.constant 0 : i32
    %24 = arith.cmpi ne, %23, %c0_i32_17 : i32
    scf.if %24 {
      %c0_18 = arith.constant 0 : index
      %c0_19 = arith.constant 0 : index
      %25 = vector.load %arg8[%c0_18, %c0_19] : memref<16x128xf32, #tpu.memory_space<vmem>>, vector<16x128xf32>
      %c0_20 = arith.constant 0 : index
      %c0_21 = arith.constant 0 : index
      %26 = vector.load %arg6[%c0_20, %c0_21] : memref<1x128xf32, #tpu.memory_space<vmem>>, vector<1x128xf32>
      %27 = vector.broadcast %26 : vector<1x128xf32> to vector<16x128xf32>
      %28 = arith.addf %25, %27 : vector<16x128xf32>
      %c0_22 = arith.constant 0 : index
      %c0_23 = arith.constant 0 : index
      %29 = vector.load %arg7[%c0_22, %c0_23] : memref<16x128xf32, #tpu.memory_space<vmem>>, vector<16x128xf32>
      tpu.vector_store %arg7[%c0_22, %c0_23], %28 {strides = array<i32>} : memref<16x128xf32, #tpu.memory_space<vmem>>, vector<16x128xf32>,
    } else {
    }
    return
  }
  func.func @transform_0(%arg0: i32, %arg1: i32) -> (i32, i32) {
    %c0_i32 = arith.constant 0 : i32
    %c0_i32_0 = arith.constant 0 : i32
    return %arg0, %c0_i32 : i32, i32
  }
  func.func @transform_1(%arg0: i32, %arg1: i32) -> (i32, i32) {
    %c0_i32 = arith.constant 0 : i32
    %c0_i32_0 = arith.constant 0 : i32
    return %c0_i32, %arg1 : i32, i32
  }
  func.func @transform_2(%arg0: i32, %arg1: i32) -> (i32, i32) {
    %c0_i32 = arith.constant 0 : i32
    %c0_i32_0 = arith.constant 0 : i32
    return %c0_i32, %arg1 : i32, i32
  }
  func.func @transform_3(%arg0: i32, %arg1: i32) -> (i32, i32) {
    %c0_i32 = arith.constant 0 : i32
    %c0_i32_0 = arith.constant 0 : i32
    return %arg1, %c0_i32 : i32, i32
  }
  func.func @transform_4(%arg0: i32, %arg1: i32) -> (i32, i32) {
    %c0_i32 = arith.constant 0 : i32
    %c0_i32_0 = arith.constant 0 : i32
    %c0_i32_1 = arith.constant 0 : i32
    return %c0_i32, %c0_i32_0 : i32, i32
  }
  func.func @transform_5(%arg0: i32, %arg1: i32) -> (i32, i32) {
    %c0_i32 = arith.constant 0 : i32
    %c0_i32_0 = arith.constant 0 : i32
    return %arg0, %c0_i32 : i32, i32
  }
}

</mosaic_0001>

<bundles_post_ra>
// kernel: tpu_custom_call.1
= control target key start
LH: loop header
LB: loop body
LE: loop exit
PB: predicated region body
PF: predicated region fallthrough
CT: control target
= control target key end

     0   :  { %10 = vsyncpa [#allocation4], 0  ;;  %s1346_s0 = inlined_call_operand.hbm [shape: f32[16,128], index: 0, kind: input, shape index: {}]   ;;  %s1347_s1 = inlined_call_operand.hbm [shape: f32[128,512], index: 1, kind: input, shape index: {}]   ;;  %s1348_s2 = inlined_call_operand.hbm [shape: f32[1,512], index: 2, kind: input, shape index: {}]   ;;  %s1349_s3 = inlined_call_operand.hbm [shape: f32[512,128], index: 3, kind: input, shape index: {}]   ;;  %s1350_s4 = inlined_call_operand.vmem [shape: f32[1,128], index: 4, kind: input, shape index: {}]   ;;  %s1351_s5 = inlined_call_operand.hbm [shape: f32[16,128], index: 5, kind: output, shape index: {}]  }
   0x1   :  { %11 = vsyncpa [#allocation7], 0 }
   0x2   :  { %12 = vsyncpa [#allocation10], 0  ;;  %s31_s20 = sshll.u32 %s1347_s1, 4  ;;  %s32_s20 = int_to_ptr.hbm [resolvable:$true] %s31_s20 }
   0x3   :  { %13 = vsyncpa [#allocation5], 0  ;;  %s966_s21 = smov [#allocation6]   ;;  %s18_s25 = sshll.u32 %s1346_s0, 4  ;;  %s19_s25 = int_to_ptr.hbm [resolvable:$true] %s18_s25 }
   0x4   :  { %s33_s22 = sshll.u32 %s966_s21, 4  ;;  %s967_s26 = smov 512   ;;  %s34_s22 = int_to_ptr.vmem [resolvable:$true] %s33_s22 }
   0x5   :  { %s968_s27 = smov 32   ;;  %s969_s28 = smov [#allocation3]  }
   0x6   :  { %39 = dma.hbm_to_vmem [thread:$0]  %s32_s20, 8192, %s34_s22, [#allocation7], %s967_s26, %s967_s26, %s968_s27  }
   0x7   :  { %s20_s29 = sshll.u32 %s969_s28, 4  ;;  %s970_s30 = smov 128   ;;  %s21_s29 = int_to_ptr.vmem [resolvable:$true] %s20_s29 }
   0x8   :  { %s971_s6 = smov 8   ;;  %s45_s8 = sshll.u32 %s1348_s2, 4  ;;  %s46_s8 = int_to_ptr.hbm [resolvable:$true] %s45_s8 }
   0x9   :  { %26 = dma.hbm_to_vmem [thread:$0]  %s19_s25, 256, %s21_s29, [#allocation4], %s970_s30, %s970_s30, %s971_s6  }
   0xa   :  { %s972_s9 = smov [#allocation8]   ;;  %s55_s12 = sshll.u32 %s1349_s3, 4  ;;  %s56_s12 = int_to_ptr.hbm [resolvable:$true] %s55_s12 }
   0xb   :  { %s47_s0 = sshll.u32 %s972_s9, 4  ;;  %s973_s13 = smov [#allocation9]   ;;  %s48_s0 = int_to_ptr.vmem [resolvable:$true] %s47_s0 }
   0xc   :  { %50 = dma.hbm_to_vmem [thread:$0]  %s46_s8, 64, %s48_s0, [#allocation7]  }
   0xd   :  { %s57_s14 = sshll.u32 %s973_s13, 4  ;;  %s58_s14 = int_to_ptr.vmem [resolvable:$true] %s57_s14 }
   0xe   :  { %63 = dma.hbm_to_vmem [thread:$0]  %s56_s12, 8192, %s58_s14, [#allocation10], %s970_s30, %s970_s30, %s971_s6  }
   0xf   :  { %958 = dma.done.wait [#allocation4], 256  }
  0x10   :  { %959 = vsyncadd [#allocation4], 4294967040 }
  0x11   :  { %960 = dma.done.wait [#allocation7], 8256  }
  0x12   :  { %961 = vsyncadd [#allocation7], 4294959040 }
  0x13   :  { %962 = dma.done.wait [#allocation10], 8192  }
  0x14   :  { %963 = vsyncadd [#allocation10], 4294959104  ;;  %v150_v0 = vld [vmem:[#allocation6 + $0x1e0] sm:$0xff]  ;;  %v151_v1 = vld [vmem:[#allocation6 + $0x1e8] sm:$0xff]  ;;  %s974_s15 = smov [#allocation11]   ;;  %s789_s19 = sshll.u32 %s1351_s5, 4  ;;  %s790_s19 = int_to_ptr.hbm [resolvable:$true] %s789_s19 }
  0x15   :  { %v152_v2 = vld [vmem:[#allocation6 + $0x1f0] sm:$0xff]  ;;  %164 = vmatpush.msra.mxu0 %v150_v0  ;;  %187 = vmatpush.msra.mxu1 %v151_v1  ;;  %v153_v3 = vld [vmem:[#allocation6 + $0x1f8] sm:$0xff]  ;;  %v146_v4 = vld [vmem:[#allocation6 + $0x1c0] sm:$0xff]  ;;  %s787_s16 = sshll.u32 %s974_s15, 4  ;;  %s788_s16 = int_to_ptr.vmem [resolvable:$true] %s787_s16 }
  0x16   :  { %v147_v5 = vld [vmem:[#allocation6 + $0x1c8] sm:$0xff]  ;;  %210 = vmatpush.msra.mxu2 %v152_v2  ;;  %233 = vmatpush.msra.mxu3 %v153_v3  ;;  %v148_v6 = vld [vmem:[#allocation6 + $0x1d0] sm:$0xff]  ;;  %v149_v7 = vld [vmem:[#allocation6 + $0x1d8] sm:$0xff] }
  0x17   :  { %v142_v8 = vld [vmem:[#allocation6 + $0x1a0] sm:$0xff]  ;;  %165 = vmatpush.msra.mxu0 %v146_v4  ;;  %188 = vmatpush.msra.mxu1 %v147_v5  ;;  %v143_v9 = vld [vmem:[#allocation6 + $0x1a8] sm:$0xff]  ;;  %v144_v10 = vld [vmem:[#allocation6 + $0x1b0] sm:$0xff] }
  0x18   :  { %v145_v11 = vld [vmem:[#allocation6 + $0x1b8] sm:$0xff]  ;;  %211 = vmatpush.msra.mxu2 %v148_v6  ;;  %234 = vmatpush.msra.mxu3 %v149_v7  ;;  %v138_v12 = vld [vmem:[#allocation6 + $0x180] sm:$0xff]  ;;  %v139_v13 = vld [vmem:[#allocation6 + $0x188] sm:$0xff] }
  0x19   :  { %166 = vmatpush.msra.mxu0 %v142_v8  ;;  %189 = vmatpush.msra.mxu1 %v143_v9  ;;  %v140_v14 = vld [vmem:[#allocation6 + $0x190] sm:$0xff]  ;;  %v141_v15 = vld [vmem:[#allocation6 + $0x198] sm:$0xff]  ;;  %v134_v16 = vld [vmem:[#allocation6 + $0x160] sm:$0xff] }
  0x1a   :  { %212 = vmatpush.msra.mxu2 %v144_v10  ;;  %235 = vmatpush.msra.mxu3 %v145_v11  ;;  %v135_v17 = vld [vmem:[#allocation6 + $0x168] sm:$0xff]  ;;  %v136_v18 = vld [vmem:[#allocation6 + $0x170] sm:$0xff]  ;;  %v137_v19 = vld [vmem:[#allocation6 + $0x178] sm:$0xff] }
  0x1b   :  { %167 = vmatpush.msra.mxu0 %v138_v12  ;;  %190 = vmatpush.msra.mxu1 %v139_v13  ;;  %v130_v20 = vld [vmem:[#allocation6 + $0x140] sm:$0xff]  ;;  %v131_v21 = vld [vmem:[#allocation6 + $0x148] sm:$0xff]  ;;  %v132_v22 = vld [vmem:[#allocation6 + $0x150] sm:$0xff] }
  0x1c   :  { %213 = vmatpush.msra.mxu2 %v140_v14  ;;  %236 = vmatpush.msra.mxu3 %v141_v15  ;;  %v133_v23 = vld [vmem:[#allocation6 + $0x158] sm:$0xff]  ;;  %v126_v24 = vld [vmem:[#allocation6 + $0x120] sm:$0xff]  ;;  %v127_v25 = vld [vmem:[#allocation6 + $0x128] sm:$0xff] }
  0x1d   :  { %168 = vmatpush.msra.mxu0 %v134_v16  ;;  %191 = vmatpush.msra.mxu1 %v135_v17  ;;  %v128_v26 = vld [vmem:[#allocation6 + $0x130] sm:$0xff]  ;;  %v129_v27 = vld [vmem:[#allocation6 + $0x138] sm:$0xff]  ;;  %v122_v28 = vld [vmem:[#allocation6 + $0x100] sm:$0xff] }
  0x1e   :  { %214 = vmatpush.msra.mxu2 %v136_v18  ;;  %237 = vmatpush.msra.mxu3 %v137_v19  ;;  %v123_v29 = vld [vmem:[#allocation6 + $0x108] sm:$0xff]  ;;  %v124_v30 = vld [vmem:[#allocation6 + $0x110] sm:$0xff]  ;;  %v125_v31 = vld [vmem:[#allocation6 + $0x118] sm:$0xff] }
  0x1f   :  { %169 = vmatpush.msra.mxu0 %v130_v20  ;;  %192 = vmatpush.msra.mxu1 %v131_v21  ;;  %v118_v32 = vld [vmem:[#allocation6 + $0xe0] sm:$0xff]  ;;  %v119_v33 = vld [vmem:[#allocation6 + $0xe8] sm:$0xff]  ;;  %v120_v34 = vld [vmem:[#allocation6 + $0xf0] sm:$0xff] }
  0x20   :  { %215 = vmatpush.msra.mxu2 %v132_v22  ;;  %238 = vmatpush.msra.mxu3 %v133_v23  ;;  %v121_v35 = vld [vmem:[#allocation6 + $0xf8] sm:$0xff]  ;;  %v114_v36 = vld [vmem:[#allocation6 + $0xc0] sm:$0xff]  ;;  %v115_v37 = vld [vmem:[#allocation6 + $0xc8] sm:$0xff] }
  0x21   :  { %170 = vmatpush.msra.mxu0 %v126_v24  ;;  %193 = vmatpush.msra.mxu1 %v127_v25  ;;  %v116_v38 = vld [vmem:[#allocation6 + $0xd0] sm:$0xff]  ;;  %v117_v39 = vld [vmem:[#allocation6 + $0xd8] sm:$0xff]  ;;  %v110_v40 = vld [vmem:[#allocation6 + $0xa0] sm:$0xff] }
  0x22   :  { %216 = vmatpush.msra.mxu2 %v128_v26  ;;  %239 = vmatpush.msra.mxu3 %v129_v27  ;;  %v111_v41 = vld [vmem:[#allocation6 + $0xa8] sm:$0xff]  ;;  %v112_v42 = vld [vmem:[#allocation6 + $0xb0] sm:$0xff]  ;;  %v113_v43 = vld [vmem:[#allocation6 + $0xb8] sm:$0xff] }
  0x23   :  { %171 = vmatpush.msra.mxu0 %v122_v28  ;;  %194 = vmatpush.msra.mxu1 %v123_v29  ;;  %v106_v44 = vld [vmem:[#allocation6 + $0x80] sm:$0xff]  ;;  %v107_v45 = vld [vmem:[#allocation6 + $0x88] sm:$0xff]  ;;  %v108_v46 = vld [vmem:[#allocation6 + $0x90] sm:$0xff] }
  0x24   :  { %217 = vmatpush.msra.mxu2 %v124_v30  ;;  %240 = vmatpush.msra.mxu3 %v125_v31  ;;  %v109_v47 = vld [vmem:[#allocation6 + $0x98] sm:$0xff]  ;;  %v102_v48 = vld [vmem:[#allocation6 + $0x60] sm:$0xff]  ;;  %v103_v49 = vld [vmem:[#allocation6 + $0x68] sm:$0xff] }
  0x25   :  { %172 = vmatpush.msra.mxu0 %v118_v32  ;;  %195 = vmatpush.msra.mxu1 %v119_v33  ;;  %v104_v50 = vld [vmem:[#allocation6 + $0x70] sm:$0xff]  ;;  %v105_v51 = vld [vmem:[#allocation6 + $0x78] sm:$0xff]  ;;  %v98_v52 = vld [vmem:[#allocation6 + $0x40] sm:$0xff] }
  0x26   :  { %218 = vmatpush.msra.mxu2 %v120_v34  ;;  %241 = vmatpush.msra.mxu3 %v121_v35  ;;  %v99_v53 = vld [vmem:[#allocation6 + $0x48] sm:$0xff]  ;;  %v100_v54 = vld [vmem:[#allocation6 + $0x50] sm:$0xff]  ;;  %v101_v55 = vld [vmem:[#allocation6 + $0x58] sm:$0xff] }
  0x27   :  { %173 = vmatpush.msra.mxu0 %v114_v36  ;;  %196 = vmatpush.msra.mxu1 %v115_v37  ;;  %v94_v56 = vld [vmem:[#allocation6 + $0x20] sm:$0xff]  ;;  %v95_v57 = vld [vmem:[#allocation6 + $0x28] sm:$0xff]  ;;  %v96_v58 = vld [vmem:[#allocation6 + $0x30] sm:$0xff] }
  0x28   :  { %219 = vmatpush.msra.mxu2 %v116_v38  ;;  %242 = vmatpush.msra.mxu3 %v117_v39  ;;  %v97_v59 = vld [vmem:[#allocation6 + $0x38] sm:$0xff]  ;;  %v90_v60 = vld [vmem:[#allocation6] sm:$0xff]  ;;  %v91_v61 = vld [vmem:[#allocation6 + $0x8] sm:$0xff] }
  0x29   :  { %174 = vmatpush.msra.mxu0 %v110_v40  ;;  %197 = vmatpush.msra.mxu1 %v111_v41  ;;  %v92_v62 = vld [vmem:[#allocation6 + $0x10] sm:$0xff]  ;;  %v93_v63 = vld [vmem:[#allocation6 + $0x18] sm:$0xff]  ;;  %v1023_v2 = vld [vmem:[#allocation8] sm:$0xf] }
  0x2a   :  { %220 = vmatpush.msra.mxu2 %v112_v42  ;;  %243 = vmatpush.msra.mxu3 %v113_v43  ;;  %v88_v0 = vld [vmem:[#allocation3] sm:$0xff]  ;;  %v89_v1 = vld [vmem:[#allocation3 + $0x8] sm:$0xff]  ;;  %v156_v3 = vperm.slane %v1023_v2, 0  ;;  %v157_v4 = vperm.slane %v1023_v2, 1  ;;  %v158_v11 = vperm.slane %v1023_v2, 2  ;;  %v159_v12 = vperm.slane %v1023_v2, 3 }
  0x2b   :  { %175 = vmatpush.msra.mxu0 %v106_v44  ;;  %198 = vmatpush.msra.mxu1 %v107_v45 }
  0x2c   :  { %221 = vmatpush.msra.mxu2 %v108_v46  ;;  %244 = vmatpush.msra.mxu3 %v109_v47 }
  0x2d   :  { %176 = vmatpush.msra.mxu0 %v102_v48  ;;  %199 = vmatpush.msra.mxu1 %v103_v49 }
  0x2e   :  { %222 = vmatpush.msra.mxu2 %v104_v50  ;;  %245 = vmatpush.msra.mxu3 %v105_v51 }
  0x2f   :  { %177 = vmatpush.msra.mxu0 %v98_v52  ;;  %200 = vmatpush.msra.mxu1 %v99_v53 }
  0x30   :  { %223 = vmatpush.msra.mxu2 %v100_v54  ;;  %246 = vmatpush.msra.mxu3 %v101_v55 }
  0x31   :  { %178 = vmatpush.msra.mxu0 %v94_v56  ;;  %201 = vmatpush.msra.mxu1 %v95_v57 }
  0x32   :  { %224 = vmatpush.msra.mxu2 %v96_v58  ;;  %247 = vmatpush.msra.mxu3 %v97_v59 }
  0x33   :  { %179 = vmatpush.msra.mxu0 %v90_v60  ;;  %202 = vmatpush.msra.mxu1 %v91_v61 }
  0x34   :  { %225 = vmatpush.msra.mxu2 %v92_v62  ;;  %248 = vmatpush.msra.mxu3 %v93_v63 }
  0x35   :  { %180 = vmatmul.f32.vlgmr.msra.gmra.mxu0 %v88_v0  ;;  %203 = vmatmul.f32.vlgmr.msra.gmra.mxu1 %v88_v0 }
  0x36   :  { %226 = vmatmul.f32.vlgmr.msra.gmra.mxu2 %v88_v0  ;;  %249 = vmatmul.f32.vlgmr.msra.gmra.mxu3 %v88_v0  ;;  %v625_v0 = vld [vmem:[#allocation9 + $0x78] sm:$0xff] }
  0x37   :  { %674 = vmatpush.msrb.mxu0 %v625_v0 }
  0x3d   :  { %183 = vmatmul.f32.gmra.mxu0 %v89_v1  ;;  %206 = vmatmul.f32.gmra.mxu1 %v89_v1 }
  0x3e   :  { %229 = vmatmul.f32.gmra.mxu2 %v89_v1  ;;  %252 = vmatmul.f32.gmra.mxu3 %v89_v1  ;;  %v641_v1 = vld [vmem:[#allocation9 + $0xf8] sm:$0xff] }
  0x3f   :  { %697 = vmatpush.msrb.mxu1 %v641_v1  ;;  %v620_v1 = vld [vmem:[#allocation9 + $0x50] sm:$0xff] }
  0xb2   :  { %v181_v5 = vpop.f32.mrf.mxu0  ;;  %v204_v6 = vpop.f32.mrf.mxu1 }
  0xb3   :  { %v1027_v7 = vadd.f32 %v181_v5, %v156_v3  ;;  %v1031_v8 = vadd.f32 %v204_v6, %v157_v4 }
  0xb5   :  { %v1034_v9 = vmul.f32 0.70710677, %v1027_v7  ;;  %v1037_v10 = vmul.f32 0.70710677, %v1031_v8 }
  0xb7   :  { %v272_v13 = vmul.f32 %v1034_v9, %v1034_v9  ;;  %v312_v14 = vmul.f32 %v1037_v10, %v1037_v10 }
  0xb9   :  { %v1045_v15 = vmin.f32 %v272_v13, 16.0  ;;  %v1047_v16 = vmin.f32 %v312_v14, 16.0  ;;  %v227_v17 = vpop.f32.mrf.mxu2  ;;  %v250_v18 = vpop.f32.mrf.mxu3 }
  0xba   :  { %v1051_v19 = vadd.f32 %v227_v17, %v158_v11  ;;  %v1055_v20 = vadd.f32 %v250_v18, %v159_v12  ;;  %v184_v44 = vpop.f32.mrf.mxu0 }
  0xbb   :  { %v274_v21 = vmul.f32 2.1237322e-06, %v1045_v15  ;;  %v285_v22 = vmul.f32 3.8918573e-05, %v1045_v15  ;;  %v314_v23 = vmul.f32 2.1237322e-06, %v1047_v16  ;;  %v1085_v55 = vadd.f32 %v184_v44, %v156_v3 }
  0xbc   :  { %v325_v24 = vmul.f32 3.8918573e-05, %v1047_v16  ;;  %v1062_v25 = vmul.f32 0.70710677, %v1051_v19  ;;  %v1067_v31 = vmul.f32 0.70710677, %v1055_v20 }
  0xbd   :  { %v275_v26 = vadd.f32 0.00028619796, %v274_v21  ;;  %v286_v27 = vadd.f32 0.001143296, %v285_v22  ;;  %v315_v28 = vadd.f32 0.00028619796, %v314_v23 }
  0xbe   :  { %v326_v29 = vadd.f32 0.001143296, %v325_v24  ;;  %v352_v30 = vmul.f32 %v1062_v25, %v1062_v25  ;;  %v392_v37 = vmul.f32 %v1067_v31, %v1067_v31  ;;  %v1098_v23 = vmul.f32 0.70710677, %v1085_v55  ;;  %v624_v24 = vld [vmem:[#allocation9 + $0x70] sm:$0xff]  ;;  %v657_v44 = vld [vmem:[#allocation9 + $0x178] sm:$0xff] }
  0xbf   :  { %v276_v32 = vmul.f32 %v275_v26, %v1045_v15  ;;  %v287_v33 = vmul.f32 %v286_v27, %v1045_v15  ;;  %v316_v34 = vmul.f32 %v315_v28, %v1047_v16  ;;  %v640_v26 = vld [vmem:[#allocation9 + $0xf0] sm:$0xff]  ;;  %675 = vmatpush.msrb.mxu0 %v624_v24  ;;  %720 = vmatpush.msrb.mxu2 %v657_v44 }
  0xc0   :  { %v327_v35 = vmul.f32 %v326_v29, %v1047_v16  ;;  %v1073_v36 = vmin.f32 %v352_v30, 16.0  ;;  %v1082_v48 = vmin.f32 %v392_v37, 16.0  ;;  %698 = vmatpush.msrb.mxu1 %v640_v26  ;;  %v623_v30 = vld [vmem:[#allocation9 + $0x68] sm:$0xff] }
  0xc1   :  { %v277_v38 = vadd.f32 0.0036580483, %v276_v32  ;;  %v288_v39 = vadd.f32 0.014752088, %v287_v33  ;;  %v317_v40 = vadd.f32 0.0036580483, %v316_v34  ;;  %676 = vmatpush.msrb.mxu0 %v623_v30 }
  0xc2   :  { %v328_v41 = vadd.f32 0.014752088, %v327_v35  ;;  %v354_v42 = vmul.f32 2.1237322e-06, %v1073_v36  ;;  %v365_v43 = vmul.f32 3.8918573e-05, %v1073_v36 }
  0xc3   :  { %v278_v45 = vmul.f32 %v277_v38, %v1045_v15  ;;  %v289_v46 = vmul.f32 %v288_v39, %v1045_v15  ;;  %v318_v47 = vmul.f32 %v317_v40, %v1047_v16  ;;  %v394_v59 = vmul.f32 2.1237322e-06, %v1082_v48  ;;  %v639_v32 = vld [vmem:[#allocation9 + $0xe8] sm:$0xff]  ;;  %v622_v40 = vld [vmem:[#allocation9 + $0x60] sm:$0xff] }
  0xc4   :  { %v329_v49 = vmul.f32 %v328_v41, %v1047_v16  ;;  %v355_v50 = vadd.f32 0.00028619796, %v354_v42  ;;  %v366_v51 = vadd.f32 0.001143296, %v365_v43  ;;  %v405_v63 = vmul.f32 3.8918573e-05, %v1082_v48  ;;  %699 = vmatpush.msrb.mxu1 %v639_v32  ;;  %677 = vmatpush.msrb.mxu0 %v622_v40 }
  0xc5   :  { %v279_v52 = vadd.f32 0.05243302, %v278_v45  ;;  %v290_v53 = vadd.f32 0.112945676, %v289_v46  ;;  %v319_v54 = vadd.f32 0.05243302, %v318_v47  ;;  %v207_v47 = vpop.f32.mrf.mxu1 }
  0xc6   :  { %v330_v56 = vadd.f32 0.112945676, %v329_v49  ;;  %v356_v57 = vmul.f32 %v355_v50, %v1073_v36  ;;  %v367_v58 = vmul.f32 %v366_v51, %v1073_v36  ;;  %v395_v13 = vadd.f32 0.00028619796, %v394_v59  ;;  %v638_v43 = vld [vmem:[#allocation9 + $0xe0] sm:$0xff]  ;;  %v673_v45 = vld [vmem:[#allocation9 + $0x1f8] sm:$0xff] }
  0xc7   :  { %v280_v60 = vmul.f32 %v279_v52, %v1045_v15  ;;  %v291_v61 = vmul.f32 %v290_v53, %v1045_v15  ;;  %v320_v62 = vmul.f32 %v319_v54, %v1047_v16  ;;  %v406_v29 = vadd.f32 0.001143296, %v405_v63  ;;  %700 = vmatpush.msrb.mxu1 %v638_v43  ;;  %v621_v49 = vld [vmem:[#allocation9 + $0x58] sm:$0xff]  ;;  %v656_v51 = vld [vmem:[#allocation9 + $0x170] sm:$0xff]  ;;  %743 = vmatpush.msrb.mxu3 %v673_v45  ;;  %v670_v30 = vld [vmem:[#allocation9 + $0x1e0] sm:$0xff] }
  0xc8   :  { %v331_v3 = vmul.f32 %v330_v56, %v1047_v16  ;;  %v357_v5 = vadd.f32 0.0036580483, %v356_v57  ;;  %v368_v6 = vadd.f32 0.014752088, %v367_v58  ;;  %v396_v22 = vmul.f32 %v395_v13, %v1082_v48  ;;  %v637_v50 = vld [vmem:[#allocation9 + $0xd8] sm:$0xff]  ;;  %v230_v56 = vpop.f32.mrf.mxu2  ;;  %v253_v57 = vpop.f32.mrf.mxu3  ;;  %678 = vmatpush.msrb.mxu0 %v621_v49  ;;  %721 = vmatpush.msrb.mxu2 %v656_v51  ;;  %v652_v49 = vld [vmem:[#allocation9 + $0x150] sm:$0xff] }
  0xc9   :  { %v281_v14 = vadd.f32 0.18741608, %v280_v60  ;;  %v292_v17 = vadd.f32 0.4994258, %v291_v61  ;;  %v321_v28 = vadd.f32 0.18741608, %v320_v62  ;;  %v407_v46 = vmul.f32 %v406_v29, %v1082_v48  ;;  %701 = vmatpush.msrb.mxu1 %v637_v50 }
  0xca   :  { %v332_v18 = vadd.f32 0.4994258, %v331_v3  ;;  %v369_v21 = vmul.f32 %v368_v6, %v1073_v36  ;;  %v358_v35 = vmul.f32 %v357_v5, %v1073_v36  ;;  %v397_v39 = vadd.f32 0.0036580483, %v396_v22  ;;  %v636_v3 = vld [vmem:[#allocation9 + $0xd0] sm:$0xff]  ;;  %679 = vmatpush.msrb.mxu0 %v620_v1  ;;  %v654_v29 = vld [vmem:[#allocation9 + $0x160] sm:$0xff] }
  0xcb   :  { %v293_v27 = vmul.f32 %v292_v17, %v1045_v15  ;;  %v282_v33 = vmul.f32 %v281_v14, %v1045_v15  ;;  %v322_v15 = vmul.f32 %v321_v28, %v1047_v16  ;;  %v432_v54 = vmul.f32 %v1098_v23, %v1098_v23  ;;  %702 = vmatpush.msrb.mxu1 %v636_v3  ;;  %v655_v14 = vld [vmem:[#allocation9 + $0x168] sm:$0xff]  ;;  %v669_v43 = vld [vmem:[#allocation9 + $0x1d8] sm:$0xff] }
  0xcc   :  { %v333_v34 = vmul.f32 %v332_v18, %v1047_v16  ;;  %v370_v37 = vadd.f32 0.112945676, %v369_v21  ;;  %v359_v53 = vadd.f32 0.05243302, %v358_v35  ;;  %v672_v16 = vld [vmem:[#allocation9 + $0x1f0] sm:$0xff]  ;;  %v398_v58 = vmul.f32 %v397_v39, %v1082_v48  ;;  %722 = vmatpush.msrb.mxu2 %v655_v14  ;;  %v619_v21 = vld [vmem:[#allocation9 + $0x48] sm:$0xff] }
  0xcd   :  { %v1104_v38 = vadd.f32 1.0, %v293_v27  ;;  %v283_v52 = vadd.f32 1.1283791, %v282_v33  ;;  %v1118_v60 = vadd.f32 %v207_v47, %v157_v4  ;;  %744 = vmatpush.msrb.mxu3 %v672_v16  ;;  %v323_v61 = vadd.f32 1.1283791, %v322_v15  ;;  %680 = vmatpush.msrb.mxu0 %v619_v21  ;;  %v635_v28 = vld [vmem:[#allocation9 + $0xc8] sm:$0xff] }
  0xce   :  { %v1106_v41 = vadd.f32 1.0, %v333_v34  ;;  %v371_v42 = vmul.f32 %v370_v37, %v1073_v36  ;;  %v408_v62 = vadd.f32 0.014752088, %v407_v46  ;;  %v1122_v63 = vadd.f32 %v230_v56, %v158_v11  ;;  %v671_v11 = vld [vmem:[#allocation9 + $0x1e8] sm:$0xff]  ;;  %703 = vmatpush.msrb.mxu1 %v635_v28  ;;  %723 = vmatpush.msrb.mxu2 %v654_v29  ;;  %v618_v37 = vld [vmem:[#allocation9 + $0x40] sm:$0xff]  ;;  %v617_v46 = vld [vmem:[#allocation9 + $0x38] sm:$0xff] }
  0xcf   :  { %822 = vrcp.f32 %v1104_v38  ;;  %v1126_v0 = vadd.f32 %v253_v57, %v159_v12  ;;  %v1129_v5 = vmul.f32 %v283_v52, %v1034_v9  ;;  %v360_v4 = vmul.f32 %v359_v53, %v1073_v36  ;;  %745 = vmatpush.msrb.mxu3 %v671_v11  ;;  %v634_v39 = vld [vmem:[#allocation9 + $0xc0] sm:$0xff]  ;;  %681 = vmatpush.msrb.mxu0 %v618_v37  ;;  %v633_v47 = vld [vmem:[#allocation9 + $0xb8] sm:$0xff]  ;;  %v616_v56 = vld [vmem:[#allocation9 + $0x30] sm:$0xff] }
  0xd0   :  { %824 = vrcp.f32 %v1106_v41  ;;  %v372_v59 = vadd.f32 0.4994258, %v371_v42  ;;  %v1133_v13 = vmin.f32 %v432_v54, 16.0  ;;  %v304_v2 = vand.u32 2147483647, %v1104_v38  ;;  %704 = vmatpush.msrb.mxu1 %v634_v39  ;;  %v668_v54 = vld [vmem:[#allocation9 + $0x1d0] sm:$0xff] }
  0xd1   :  { %v306_v12 = vand.u32 2147483648, %v1104_v38  ;;  %v399_v18 = vadd.f32 0.05243302, %v398_v58  ;;  %v409_v9 = vmul.f32 %v408_v62, %v1082_v48  ;;  %vm300_vm0 = vweird.f32 %v1104_v38  ;;  %746 = vmatpush.msrb.mxu3 %v670_v30  ;;  %682 = vmatpush.msrb.mxu0 %v617_v46  ;;  %v632_v57 = vld [vmem:[#allocation9 + $0xb0] sm:$0xff]  ;;  %v651_v62 = vld [vmem:[#allocation9 + $0x148] sm:$0xff]  ;;  %v614_v28 = vld [vmem:[#allocation9 + $0x20] sm:$0xff] }
  0xd2   :  { %v373_v6 = vmul.f32 %v372_v59, %v1073_v36  ;;  %v1148_v27 = vmul.f32 0.70710677, %v1118_v60  ;;  %v1151_v32 = vmul.f32 %v323_v61, %v1037_v10  ;;  %v344_v34 = vand.u32 2147483647, %v1106_v41  ;;  %v653_v10 = vld [vmem:[#allocation9 + $0x158] sm:$0xff]  ;;  %705 = vmatpush.msrb.mxu1 %v633_v47  ;;  %v615_v14 = vld [vmem:[#allocation9 + $0x28] sm:$0xff] }
  0xd3   :  { %v410_v35 = vadd.f32 0.112945676, %v409_v9  ;;  %v346_v42 = vand.u32 2147483648, %v1106_v41  ;;  %vm340_vm2 = vweird.f32 %v1106_v41  ;;  %v1162_v15 = vmul.f32 0.70710677, %v1122_v63  ;;  %724 = vmatpush.msrb.mxu2 %v653_v10  ;;  %747 = vmatpush.msrb.mxu3 %v669_v43  ;;  %v631_v11 = vld [vmem:[#allocation9 + $0xa8] sm:$0xff] }
  0xd4   :  { %v1145_v26 = vadd.f32 1.0, %v373_v6  ;;  %v361_v51 = vadd.f32 0.18741608, %v360_v4  ;;  %v400_v52 = vmul.f32 %v399_v18, %v1082_v48  ;;  %v472_v53 = vmul.f32 %v1148_v27, %v1148_v27  ;;  %683 = vmatpush.msrb.mxu0 %v616_v56  ;;  %v667_v6 = vld [vmem:[#allocation9 + $0x1c8] sm:$0xff]  ;;  %706 = vmatpush.msrb.mxu1 %v632_v57  ;;  %v630_v39 = vld [vmem:[#allocation9 + $0xa0] sm:$0xff]  ;;  %v665_v43 = vld [vmem:[#allocation9 + $0x1b8] sm:$0xff] }
  0xd5   :  { %v1135_v17 = vpop.eup %822  ;;  %v411_v45 = vmul.f32 %v410_v35, %v1082_v48  ;;  %v434_v61 = vmul.f32 2.1237322e-06, %v1133_v13  ;;  %725 = vmatpush.msrb.mxu2 %v652_v49  ;;  %vm1180_vm5 = vcmp.eq.f32.partialorder %v304_v2, 8.507059e+37  ;;  %vm1184_vm6 = vcmp.eq.f32.partialorder %v344_v34, 8.507059e+37  ;;  %748 = vmatpush.msrb.mxu3 %v668_v54  ;;  %v648_v49 = vld [vmem:[#allocation9 + $0x130] sm:$0xff]  ;;  %v627_v4 = vld [vmem:[#allocation9 + $0x88] sm:$0xff] }
  0xd6   :  { %v1140_v22 = vpop.eup %824  ;;  %v296_v24 = vmul.f32 %v1135_v17, %v1104_v38  ;;  %vm301_vm1 = vweird.f32 %v1135_v17  ;;  %826 = vrcp.f32 %v1145_v26  ;;  %v307_v38 = vor.u32 1.1754944e-38, %v306_v12  ;;  %v650_v12 = vld [vmem:[#allocation9 + $0x140] sm:$0xff]  ;;  %684 = vmatpush.msrb.mxu0 %v615_v14  ;;  %707 = vmatpush.msrb.mxu1 %v631_v11  ;;  %v612_v16 = vld [vmem:[#allocation9 + $0x10] sm:$0xff] }
  0xd7   :  { %v336_v33 = vmul.f32 %v1140_v22, %v1106_v41  ;;  %vm1172_vm3 = vmor %vm300_vm0, %vm301_vm1  ;;  %vm341_vm4 = vweird.f32 %v1140_v22  ;;  %v412_v59 = vadd.f32 0.4994258, %v411_v45  ;;  %v1190_v21 = vmin.f32 %v472_v53, 16.0  ;;  %726 = vmatpush.msrb.mxu2 %v651_v62  ;;  %749 = vmatpush.msrb.mxu3 %v667_v6  ;;  %v646_v6 = vld [vmem:[#allocation9 + $0x120] sm:$0xff] }
  0xd8   :  { %v297_v40 = vsub.f32 1.0, %v296_v24  ;;  %v512_v2 = vmul.f32 %v1162_v15, %v1162_v15  ;;  %v666_v24 = vld [vmem:[#allocation9 + $0x1c0] sm:$0xff]  ;;  %vm1203_vm7 = vmor %vm340_vm2, %vm341_vm4  ;;  %v347_v34 = vor.u32 1.1754944e-38, %v346_v42  ;;  %v362_v35 = vmul.f32 %v361_v51, %v1073_v36  ;;  %v649_v42 = vld [vmem:[#allocation9 + $0x138] sm:$0xff]  ;;  %685 = vmatpush.msrb.mxu0 %v614_v28  ;;  %708 = vmatpush.msrb.mxu1 %v630_v39 }
  0xd9   :  { %v337_v44 = vsub.f32 1.0, %v336_v33  ;;  %v413_v9 = vmul.f32 %v412_v59, %v1082_v48  ;;  %v401_v37 = vadd.f32 0.18741608, %v400_v52  ;;  %v435_v10 = vadd.f32 0.00028619796, %v434_v61  ;;  %727 = vmatpush.msrb.mxu2 %v650_v12  ;;  %v613_v36 = vld [vmem:[#allocation9 + $0x18] sm:$0xff]  ;;  %750 = vmatpush.msrb.mxu3 %v666_v24 }
  0xda   :  { %v298_v50 = vmul.f32 %v1135_v17, %v297_v40  ;;  %v1221_v47 = vmul.f32 0.70710677, %v1126_v0  ;;  %v474_v52 = vmul.f32 2.1237322e-06, %v1190_v21  ;;  %v1225_v53 = vmin.f32 %v512_v2, 16.0  ;;  %686 = vmatpush.msrb.mxu0 %v613_v36  ;;  %v610_v2 = vld [vmem:[#allocation9] sm:$0xff] }
  0xdb   :  { %v338_v58 = vmul.f32 %v1140_v22, %v337_v44  ;;  %v1218_v46 = vadd.f32 1.0, %v413_v9  ;;  %728 = vmatpush.msrb.mxu2 %v649_v42  ;;  %v363_v56 = vadd.f32 1.1283791, %v362_v35  ;;  %v386_v57 = vand.u32 2147483648, %v1145_v26  ;;  %751 = vmatpush.msrb.mxu3 %v665_v43  ;;  %v645_v33 = vld [vmem:[#allocation9 + $0x118] sm:$0xff]  ;;  %v644_v36 = vld [vmem:[#allocation9 + $0x110] sm:$0xff] }
  0xdc   :  { %v299_v1 = vadd.f32 %v1135_v17, %v298_v50  ;;  %v1194_v29 = vpop.eup %826  ;;  %v256_v50 = vmul.f32 0.5, %v1027_v7  ;;  %v647_v7 = vld [vmem:[#allocation9 + $0x128] sm:$0xff]  ;;  %v384_v61 = vand.u32 2147483647, %v1145_v26  ;;  %v402_v62 = vmul.f32 %v401_v37, %v1082_v48  ;;  %687 = vmatpush.msrb.mxu0 %v612_v16 }
  0xdd   :  { %v339_v18 = vadd.f32 %v1140_v22, %v338_v58  ;;  %v376_v41 = vmul.f32 %v1194_v29, %v1145_v26  ;;  %828 = vrcp.f32 %v1218_v46  ;;  %v628_v58 = vld [vmem:[#allocation9 + $0x90] sm:$0xff]  ;;  %vm381_vm8 = vweird.f32 %v1194_v29  ;;  %729 = vmatpush.msrb.mxu2 %v648_v49 }
  0xde   :  { %v303_v30 = vsel %vm1172_vm3, %v1135_v17, %v299_v1  ;;  %v611_v1 = vld [vmem:[#allocation9 + $0x8] sm:$0xff]  ;;  %v257_v3 = vmul.f32 0.5, %v1031_v8  ;;  %vm380_vm9 = vweird.f32 %v1145_v26  ;;  %v436_v48 = vmul.f32 %v435_v10, %v1133_v13  ;;  %v662_v8 = vld [vmem:[#allocation9 + $0x1a0] sm:$0xff] }
  0xdf   :  { %v308_v40 = vsel %vm1180_vm5, %v307_v38, %v303_v30  ;;  %v343_v17 = vsel %vm1203_vm7, %v1140_v22, %v339_v18  ;;  %v629_v22 = vld [vmem:[#allocation9 + $0x98] sm:$0xff]  ;;  %v377_v51 = vsub.f32 1.0, %v376_v41  ;;  %v552_v38 = vmul.f32 %v1221_v47, %v1221_v47  ;;  %730 = vmatpush.msrb.mxu2 %v647_v7  ;;  %vm1245_vm10 = vmor %vm380_vm9, %vm381_vm8  ;;  %688 = vmatpush.msrb.mxu0 %v611_v1  ;;  %v626_v30 = vld [vmem:[#allocation9 + $0x80] sm:$0xff] }
  0xe0   :  { %v309_v44 = vmul.f32 %v308_v40, %v1129_v5  ;;  %v348_v45 = vsel %vm1184_vm6, %v347_v34, %v343_v17  ;;  %v664_v5 = vld [vmem:[#allocation9 + $0x1b0] sm:$0xff]  ;;  %709 = vmatpush.msrb.mxu1 %v629_v22  ;;  %v475_v18 = vadd.f32 0.00028619796, %v474_v52  ;;  %v514_v9 = vmul.f32 2.1237322e-06, %v1225_v53  ;;  %v661_v40 = vld [vmem:[#allocation9 + $0x198] sm:$0xff] }
  0xe1   :  { %v349_v54 = vmul.f32 %v348_v45, %v1151_v32  ;;  %v378_v59 = vmul.f32 %v1194_v29, %v377_v51  ;;  %v663_v32 = vld [vmem:[#allocation9 + $0x1a8] sm:$0xff]  ;;  %752 = vmatpush.msrb.mxu3 %v664_v5  ;;  %v387_v24 = vor.u32 1.1754944e-38, %v386_v57  ;;  %v1249_v28 = vmin.f32 %v552_v38, 16.0  ;;  %731 = vmatpush.msrb.mxu2 %v646_v6  ;;  %v660_v22 = vld [vmem:[#allocation9 + $0x190] sm:$0xff] }
  0xe2   :  { %v804_v14 = vclamps-f32 %v309_v44, 1.0  ;;  %710 = vmatpush.msrb.mxu1 %v628_v58  ;;  %v364_v37 = vmul.f32 %v363_v56, %v1062_v25  ;;  %vm385_vm11 = vcmp.eq.f32.partialorder %v384_v61, 8.507059e+37  ;;  %v403_v26 = vadd.f32 1.1283791, %v402_v62  ;;  %689 = vmatpush.msrb.mxu0 %v610_v2 }
  0xe3   :  { %v379_v11 = vadd.f32 %v1194_v29, %v378_v59  ;;  %753 = vmatpush.msrb.mxu3 %v663_v32  ;;  %v805_v35 = vclamps-f32 %v349_v54, 1.0  ;;  %v1255_v17 = vpop.eup %828  ;;  %v554_v10 = vmul.f32 2.1237322e-06, %v1249_v28  ;;  %v258_v25 = vmul.f32 0.5, %v1051_v19  ;;  %732 = vmatpush.msrb.mxu2 %v645_v33  ;;  %v659_v19 = vld [vmem:[#allocation9 + $0x188] sm:$0xff]  ;;  %v642_v59 = vld [vmem:[#allocation9 + $0x100] sm:$0xff] }
  0xe4   :  { %v592_v34 = vadd.f32 1.0, %v804_v14  ;;  %711 = vmatpush.msrb.mxu1 %v627_v4  ;;  %v437_v45 = vadd.f32 0.0036580483, %v436_v48  ;;  %v476_v49 = vmul.f32 %v475_v18, %v1190_v21  ;;  %v515_v51 = vadd.f32 0.00028619796, %v514_v9 }
  0xe5   :  { %v383_v39 = vsel %vm1245_vm10, %v1194_v29, %v379_v11  ;;  %754 = vmatpush.msrb.mxu3 %v662_v8  ;;  %v593_v43 = vadd.f32 1.0, %v805_v35  ;;  %v416_v29 = vmul.f32 %v1255_v17, %v1218_v46  ;;  %v555_v52 = vadd.f32 0.00028619796, %v554_v10  ;;  %733 = vmatpush.msrb.mxu2 %v644_v36 }
  0xe6   :  { %v388_v41 = vsel %vm385_vm11, %v387_v24, %v383_v39  ;;  %v600_v42 = vmul.f32 %v592_v34, %v256_v50  ;;  %712 = vmatpush.msrb.mxu1 %v626_v30  ;;  %v643_v50 = vld [vmem:[#allocation9 + $0x108] sm:$0xff]  ;;  %v404_v54 = vmul.f32 %v403_v26, %v1067_v31  ;;  %v445_v16 = vmul.f32 3.8918573e-05, %v1133_v13  ;;  %v658_v31 = vld [vmem:[#allocation9 + $0x180] sm:$0xff] }
  0xe7   :  { %v389_v44 = vmul.f32 %v388_v41, %v364_v37  ;;  %755 = vmatpush.msrb.mxu3 %v661_v40  ;;  %v601_v5 = vmul.f32 %v593_v43, %v257_v3  ;;  %v417_v56 = vsub.f32 1.0, %v416_v29  ;;  %vm420_vm12 = vweird.f32 %v1218_v46  ;;  %734 = vmatpush.msrb.mxu2 %v643_v50 }
  0xe8   :  { %690 = vmatmul.f32.vlgmr.msrb.gmra.mxu0 %v600_v42  ;;  %v424_v58 = vand.u32 2147483647, %v1218_v46  ;;  %v426_v7 = vand.u32 2147483648, %v1218_v46  ;;  %v485_v61 = vmul.f32 3.8918573e-05, %v1190_v21  ;;  %vm421_vm13 = vweird.f32 %v1255_v17 }
  0xe9   :  { %v806_v57 = vclamps-f32 %v389_v44, 1.0  ;;  %713 = vmatmul.f32.vlgmr.msrb.gmra.mxu1 %v601_v5  ;;  %756 = vmatpush.msrb.mxu3 %v660_v22  ;;  %v418_v62 = vmul.f32 %v1255_v17, %v417_v56  ;;  %v446_v1 = vadd.f32 0.001143296, %v445_v16  ;;  %v477_v3 = vadd.f32 0.0036580483, %v476_v49  ;;  %vm422_vm14 = vmor %vm420_vm12, %vm421_vm13 }
  0xea   :  { %v516_v38 = vmul.f32 %v515_v51, %v1225_v53  ;;  %v556_v4 = vmul.f32 %v555_v52, %v1249_v28  ;;  %v486_v6 = vadd.f32 0.001143296, %v485_v61  ;;  %735 = vmatpush.msrb.mxu2 %v642_v59  ;;  %v525_v18 = vmul.f32 3.8918573e-05, %v1225_v53 }
  0xeb   :  { %v594_v32 = vadd.f32 1.0, %v806_v57  ;;  %757 = vmatpush.msrb.mxu3 %v659_v19  ;;  %v419_v14 = vadd.f32 %v1255_v17, %v418_v62  ;;  %v447_v48 = vmul.f32 %v446_v1, %v1133_v13  ;;  %vm425_vm15 = vcmp.eq.f32.partialorder %v424_v58, 8.507059e+37 }
  0xec   :  { %v427_v9 = vor.u32 1.1754944e-38, %v426_v7  ;;  %v438_v8 = vmul.f32 %v437_v45, %v1133_v13  ;;  %v487_v2 = vmul.f32 %v486_v6, %v1190_v21  ;;  %v526_v30 = vadd.f32 0.001143296, %v525_v18 }
  0xed   :  { %v602_v11 = vmul.f32 %v594_v32, %v258_v25  ;;  %758 = vmatpush.msrb.mxu3 %v658_v31  ;;  %v423_v12 = vsel %vm422_vm14, %v1255_v17, %v419_v14  ;;  %v448_v24 = vadd.f32 0.014752088, %v447_v48  ;;  %v565_v33 = vmul.f32 3.8918573e-05, %v1249_v28 }
  0xee   :  { %v428_v34 = vsel %vm425_vm15, %v427_v9, %v423_v12  ;;  %v478_v35 = vmul.f32 %v477_v3, %v1190_v21  ;;  %v517_v37 = vadd.f32 0.0036580483, %v516_v38  ;;  %v557_v46 = vadd.f32 0.0036580483, %v556_v4 }
  0xef   :  { %736 = vmatmul.f32.vlgmr.msrb.gmra.mxu2 %v602_v11  ;;  %v429_v39 = vmul.f32 %v428_v34, %v404_v54  ;;  %v449_v26 = vmul.f32 %v448_v24, %v1133_v13  ;;  %v488_v40 = vadd.f32 0.014752088, %v487_v2  ;;  %v527_v41 = vmul.f32 %v526_v30, %v1225_v53 }
  0xf0   :  { %v259_v10 = vmul.f32 0.5, %v1055_v20  ;;  %v439_v42 = vadd.f32 0.05243302, %v438_v8  ;;  %v566_v17 = vadd.f32 0.001143296, %v565_v33  ;;  %v518_v45 = vmul.f32 %v517_v37, %v1225_v53 }
  0xf1   :  { %v807_v43 = vclamps-f32 %v429_v39, 1.0  ;;  %v450_v36 = vadd.f32 0.112945676, %v449_v26  ;;  %v489_v25 = vmul.f32 %v488_v40, %v1190_v21  ;;  %v528_v44 = vadd.f32 0.014752088, %v527_v41 }
  0xf2   :  { %v479_v29 = vadd.f32 0.05243302, %v478_v35  ;;  %v558_v22 = vmul.f32 %v557_v46, %v1249_v28  ;;  %v567_v49 = vmul.f32 %v566_v17, %v1249_v28  ;;  %v440_v50 = vmul.f32 %v439_v42, %v1133_v13 }
  0xf3   :  { %v595_v51 = vadd.f32 1.0, %v807_v43  ;;  %v451_v52 = vmul.f32 %v450_v36, %v1133_v13  ;;  %v490_v5 = vadd.f32 0.112945676, %v489_v25  ;;  %v529_v20 = vmul.f32 %v528_v44, %v1225_v53 }
  0xf4   :  { %v568_v54 = vadd.f32 0.014752088, %v567_v49  ;;  %v480_v58 = vmul.f32 %v479_v29, %v1190_v21  ;;  %v519_v7 = vadd.f32 0.05243302, %v518_v45  ;;  %v559_v61 = vadd.f32 0.05243302, %v558_v22 }
  0xf5   :  { %v603_v56 = vmul.f32 %v595_v51, %v259_v10  ;;  %v452_v19 = vadd.f32 0.4994258, %v451_v52  ;;  %v491_v57 = vmul.f32 %v490_v5, %v1190_v21  ;;  %v530_v16 = vadd.f32 0.112945676, %v529_v20 }
  0xf6   :  { %v569_v59 = vmul.f32 %v568_v54, %v1249_v28  ;;  %v441_v3 = vadd.f32 0.18741608, %v440_v50  ;;  %v481_v14 = vadd.f32 0.18741608, %v480_v58  ;;  %v520_v48 = vmul.f32 %v519_v7, %v1225_v53 }
  0xf7   :  { %759 = vmatmul.f32.vlgmr.msrb.gmra.mxu3 %v603_v56  ;;  %v453_v62 = vmul.f32 %v452_v19, %v1133_v13  ;;  %v492_v31 = vadd.f32 0.4994258, %v491_v57  ;;  %v531_v32 = vmul.f32 %v530_v16, %v1225_v53  ;;  %v560_v18 = vmul.f32 %v559_v61, %v1249_v28 }
  0xf8   :  { %v570_v1 = vadd.f32 0.112945676, %v569_v59  ;;  %v442_v12 = vmul.f32 %v441_v3, %v1133_v13  ;;  %v482_v24 = vmul.f32 %v481_v14, %v1190_v21  ;;  %v521_v30 = vadd.f32 0.18741608, %v520_v48 }
  0xf9   :  { %v454_v38 = vadd.f32 1.0, %v453_v62  ;;  %v493_v4 = vmul.f32 %v492_v31, %v1190_v21  ;;  %v532_v6 = vadd.f32 0.4994258, %v531_v32  ;;  %v561_v33 = vadd.f32 0.18741608, %v560_v18 }
  0xfa   :  { %v571_v11 = vmul.f32 %v570_v1, %v1249_v28  ;;  %v443_v46 = vadd.f32 1.1283791, %v442_v12  ;;  %v483_v39 = vadd.f32 1.1283791, %v482_v24  ;;  %v522_v41 = vmul.f32 %v521_v30, %v1225_v53 }
  0xfb   :  { %830 = vrcp.f32 %v454_v38  ;;  %v494_v9 = vadd.f32 1.0, %v493_v4  ;;  %v533_v8 = vmul.f32 %v532_v6, %v1225_v53  ;;  %v562_v13 = vmul.f32 %v561_v33, %v1249_v28 }
  0xfc   :  { %v572_v2 = vadd.f32 0.4994258, %v571_v11  ;;  %v464_v42 = vand.u32 2147483647, %v454_v38  ;;  %v260_v17 = vmul.f32 0.5, %v1085_v55  ;;  %v444_v43 = vmul.f32 %v443_v46, %v1098_v23 }
  0xfd   :  { %832 = vrcp.f32 %v494_v9  ;;  %v1306_v34 = vadd.f32 1.0, %v533_v8  ;;  %v466_v36 = vand.u32 2147483648, %v454_v38  ;;  %v484_v44 = vmul.f32 %v483_v39, %v1148_v27 }
  0xfe   :  { %v573_v35 = vmul.f32 %v572_v2, %v1249_v28  ;;  %v504_v45 = vand.u32 2147483647, %v494_v9  ;;  %v523_v53 = vadd.f32 1.1283791, %v522_v41  ;;  %v563_v49 = vadd.f32 1.1283791, %v562_v13 }
  0xff   :  { %834 = vrcp.f32 %v1306_v34  ;;  %v506_v51 = vand.u32 2147483648, %v494_v9  ;;  %vm460_vm1 = vweird.f32 %v454_v38  ;;  %vm465_vm2 = vcmp.eq.f32.partialorder %v464_v42, 8.507059e+37 }
 0x100   :  { %v1310_v40 = vadd.f32 1.0, %v573_v35  ;;  %v467_v55 = vor.u32 1.1754944e-38, %v466_v36  ;;  %v546_v20 = vand.u32 2147483648, %v1306_v34  ;;  %vm500_vm5 = vweird.f32 %v494_v9 }
 0x101   :  { %v831_v37 = vpop.eup %830  ;;  %vm1320_vm6 = vcmp.eq.f32.partialorder %v504_v45, 8.507059e+37  ;;  %v507_v16 = vor.u32 1.1754944e-38, %v506_v51  ;;  %v544_v61 = vand.u32 2147483647, %v1306_v34  ;;  %vm540_vm9 = vweird.f32 %v1306_v34 }
 0x102   :  { %v456_v26 = vmul.f32 %v831_v37, %v454_v38  ;;  %836 = vrcp.f32 %v1310_v40  ;;  %vm461_vm0 = vweird.f32 %v831_v37  ;;  %v547_v31 = vor.u32 1.1754944e-38, %v546_v20 }
 0x103   :  { %v833_v21 = vpop.eup %832  ;;  %vm462_vm3 = vmor %vm460_vm1, %vm461_vm0  ;;  %v586_v4 = vand.u32 2147483648, %v1310_v40  ;;  %v584_v11 = vand.u32 2147483647, %v1310_v40  ;;  %v524_v48 = vmul.f32 %v523_v53, %v1162_v15  ;;  %vm545_vm12 = vcmp.eq.f32.partialorder %v544_v61, 8.507059e+37 }
 0x104   :  { %v457_v10 = vsub.f32 1.0, %v456_v26  ;;  %v496_v25 = vmul.f32 %v833_v21, %v494_v9  ;;  %vm501_vm4 = vweird.f32 %v833_v21  ;;  %vm580_vm13 = vweird.f32 %v1310_v40 }
 0x105   :  { %v835_v22 = vpop.eup %834  ;;  %vm502_vm7 = vmor %vm500_vm5, %vm501_vm4  ;;  %v261_v24 = vmul.f32 0.5, %v1118_v60  ;;  %v564_v35 = vmul.f32 %v563_v49, %v1221_v47  ;;  %vm585_vm15 = vcmp.eq.f32.partialorder %v584_v11, 8.507059e+37  ;;  %v262_v13 = vmul.f32 0.5, %v1122_v63 }
 0x106   :  { %v458_v29 = vmul.f32 %v831_v37, %v457_v10  ;;  %v497_v28 = vsub.f32 1.0, %v496_v25  ;;  %v536_v5 = vmul.f32 %v835_v22, %v1306_v34  ;;  %vm541_vm8 = vweird.f32 %v835_v22 }
 0x107   :  { %vm542_vm10 = vmor %vm540_vm9, %vm541_vm8  ;;  %v587_v34 = vor.u32 1.1754944e-38, %v586_v4  ;;  %v263_v10 = vmul.f32 0.5, %v1126_v0 }
 0x108   :  { %v459_v52 = vadd.f32 %v831_v37, %v458_v29  ;;  %v498_v23 = vmul.f32 %v833_v21, %v497_v28  ;;  %v837_v27 = vpop.eup %836  ;;  %v537_v56 = vsub.f32 1.0, %v536_v5  ;;  %v821_v29 = vld [vmem:[%s1350_s4] ss:$0 sm:$0xff] }
 0x109   :  { %v576_v58 = vmul.f32 %v837_v27, %v1310_v40  ;;  %vm581_vm11 = vweird.f32 %v837_v27 }
 0x10a   :  { %v463_v50 = vsel %vm462_vm3, %v831_v37, %v459_v52  ;;  %v499_v57 = vadd.f32 %v833_v21, %v498_v23  ;;  %v538_v59 = vmul.f32 %v835_v22, %v537_v56  ;;  %vm582_vm14 = vmor %vm580_vm13, %vm581_vm11 }
 0x10b   :  { %v468_v19 = vsel %vm465_vm2, %v467_v55, %v463_v50  ;;  %v577_v32 = vsub.f32 1.0, %v576_v58 }
 0x10c   :  { %v469_v7 = vmul.f32 %v468_v19, %v444_v43  ;;  %v503_v62 = vsel %vm502_vm7, %v833_v21, %v499_v57  ;;  %v539_v38 = vadd.f32 %v835_v22, %v538_v59 }
 0x10d   :  { %v508_v3 = vsel %vm1320_vm6, %v507_v16, %v503_v62  ;;  %v578_v14 = vmul.f32 %v837_v27, %v577_v32 }
 0x10e   :  { %v808_v1 = vclamps-f32 %v469_v7, 1.0  ;;  %v509_v6 = vmul.f32 %v508_v3, %v484_v44  ;;  %v543_v9 = vsel %vm542_vm10, %v835_v22, %v539_v38 }
 0x10f   :  { %v548_v2 = vsel %vm545_vm12, %v547_v31, %v543_v9  ;;  %v579_v12 = vadd.f32 %v837_v27, %v578_v14 }
 0x110   :  { %v596_v18 = vadd.f32 1.0, %v808_v1  ;;  %v809_v8 = vclamps-f32 %v509_v6, 1.0  ;;  %v549_v33 = vmul.f32 %v548_v2, %v524_v48 }
 0x111   :  { %v583_v46 = vsel %vm582_vm14, %v837_v27, %v579_v12 }
 0x112   :  { %v604_v30 = vmul.f32 %v596_v18, %v260_v17  ;;  %v597_v37 = vadd.f32 1.0, %v809_v8  ;;  %v810_v15 = vclamps-f32 %v549_v33, 1.0  ;;  %v588_v39 = vsel %vm585_vm15, %v587_v34, %v583_v46 }
 0x113   :  { %v589_v41 = vmul.f32 %v588_v39, %v564_v35 }
 0x114   :  { %693 = vmatmul.f32.gmra.mxu0 %v604_v30  ;;  %v605_v26 = vmul.f32 %v597_v37, %v261_v24  ;;  %v598_v21 = vadd.f32 1.0, %v810_v15 }
 0x115   :  { %v811_v40 = vclamps-f32 %v589_v41, 1.0 }
 0x116   :  { %716 = vmatmul.f32.gmra.mxu1 %v605_v26  ;;  %v606_v60 = vmul.f32 %v598_v21, %v262_v13 }
 0x117   :  { %v599_v42 = vadd.f32 1.0, %v811_v40 }
 0x118   :  { %739 = vmatmul.f32.gmra.mxu2 %v606_v60 }
 0x119   :  { %v607_v17 = vmul.f32 %v599_v42, %v263_v10 }
 0x11b   :  { %762 = vmatmul.f32.gmra.mxu3 %v607_v17 }
 0x165   :  { %v691_v47 = vpop.f32.mrf.mxu0 }
 0x166   :  { %v714_v43 = vpop.f32.mrf.mxu1 }
 0x167   :  { %v715_v36 = vadd.f32 %v714_v43, %v691_v47 }
 0x172   :  { %v737_v25 = vpop.f32.mrf.mxu2 }
 0x173   :  { %v738_v44 = vadd.f32 %v737_v25, %v715_v36 }
 0x17a   :  { %v760_v63 = vpop.f32.mrf.mxu3 }
 0x17b   :  { %v761_v45 = vadd.f32 %v760_v63, %v738_v44 }
 0x17d   :  { %v779_v22 = vadd.f32 %v821_v29, %v761_v45 }
 0x17f   :  { %781 = vst [vmem:[#allocation11] sm:$0xff] %v779_v22 }
 0x191   :  { %v694_v53 = vpop.f32.mrf.mxu0 }
 0x193   :  { %v717_v49 = vpop.f32.mrf.mxu1 }
 0x194   :  { %v718_v0 = vadd.f32 %v717_v49, %v694_v53 }
 0x19b   :  { %v740_v28 = vpop.f32.mrf.mxu2 }
 0x19c   :  { %v741_v51 = vadd.f32 %v740_v28, %v718_v0 }
 0x19e   :  { %v763_v52 = vpop.f32.mrf.mxu3 }
 0x19f   :  { %v764_v5 = vadd.f32 %v763_v52, %v741_v51 }
 0x1a1   :  { %v780_v55 = vadd.f32 %v821_v29, %v764_v5 }
 0x1a3   :  { %782 = vst [vmem:[#allocation11 + $0x8] sm:$0xff] %v780_v55 }
 0x1a4   :  { %795 = dma.vmem_to_hbm [thread:$0]  %s788_s16, 256, %s790_s19, [#allocation5], %s970_s30, %s970_s30, %s971_s6  }
 0x1a5   :  { %964 = dma.done.wait [#allocation5], 256  }
 0x1a6   :  { %965 = vsyncadd [#allocation5], 4294967040 }
 0x1a7   :  { %800 = vsyncpa [#allocation4], 1 }
 0x1a8   :  { %801 = vsyncpa [#allocation7], 1 }
 0x1a9   :  { %802 = vsyncpa [#allocation10], 1 }
 0x1aa   :  { %803 = vsyncpa [#allocation5], 1 }

</bundles_post_ra>
